<compile_context>
chip_gen: v7x
topology: tpu7x:2x2x1
jax: 0.10.0
libtpu: 0.0.40
codegen_flags: <defaults>
</compile_context>

<pallas_src>
import jax
import jax.numpy as jnp
from jax.experimental import pallas as pl
from jax.experimental.pallas import tpu as pltpu


# Conservative VMEM budget for tile selection: safe even on v7x (64 MiB
# physical per TensorCore) with double-buffered BlockSpecs.
_VMEM_TILE_BUDGET = 24 * 1024 * 1024
_VMEM_LIMIT_BYTES = 48 * 1024 * 1024  # < 64 MiB physical on v7x


# ---------------------------------------------------------------------------
# Kernels
# ---------------------------------------------------------------------------
def _single_k_kernel(a_ref, b_ref, o_ref):
    # Whole reduction dimension present in one tile: no accumulator needed.
    o_ref[...] = jnp.dot(
        a_ref[...], b_ref[...], preferred_element_type=jnp.float32
    ).astype(o_ref.dtype)


def _acc_in_out_kernel(a_ref, b_ref, o_ref):
    # f32 output: accumulate directly in the resident output block
    # (output BlockSpec is K-invariant, so the block stays in VMEM across K).
    @pl.when(pl.program_id(2) == 0)
    def _():
        o_ref[...] = jnp.zeros_like(o_ref)

    o_ref[...] += jnp.dot(
        a_ref[...], b_ref[...], preferred_element_type=jnp.float32
    )


def _acc_scratch_kernel(a_ref, b_ref, o_ref, acc_ref):
    # Non-f32 output: accumulate in an f32 scratch, cast once at the end.
    @pl.when(pl.program_id(2) == 0)
    def _():
        acc_ref[...] = jnp.zeros_like(acc_ref)

    acc_ref[...] += jnp.dot(
        a_ref[...], b_ref[...], preferred_element_type=jnp.float32
    )

    @pl.when(pl.program_id(2) == pl.num_programs(2) - 1)
    def _():
        o_ref[...] = acc_ref[...].astype(o_ref.dtype)


# ---------------------------------------------------------------------------
# Tile selection helpers (tiles either divide the dim exactly or equal it,
# so every BlockSpec satisfies the (8, 128) constraint).
# ---------------------------------------------------------------------------
def _pick_row_tile(n, preferred=256):
    """Row tile: multiple of 8 dividing n (or full n). Prefer >=2 blocks."""
    if n <= preferred:
        if n >= 16 and n % 16 == 0:
            return n // 2  # two parallel blocks -> both TCs busy on v7x
        return n
    t = (preferred // 8) * 8
    while t >= 8:
        if n % t == 0:
            return t
        t -= 8
    return n


def _pick_tile(dim, preferred, quantum):
    """Largest multiple of `quantum` dividing `dim` that is <= preferred, else full dim."""
    if dim <= preferred:
        return dim
    t = (preferred // quantum) * quantum
    while t >= quantum:
        if dim % t == 0:
            return t
        t -= quantum
    return dim


# ---------------------------------------------------------------------------
# Wrapper
# ---------------------------------------------------------------------------
def mean_aggregator_forward(self_feats, features_neighs, neigh_matrix, *,
                            tm_pref=256, tn_pref=256,
                            vmem_limit_bytes=_VMEM_LIMIT_BYTES):
    """Pallas implementation of MeanAggregator.forward.

    self_feats:       (N, F_self)  -- unused (kept for signature parity)
    features_neighs:  (M, D)
    neigh_matrix:     (N, M)
    returns:          (N, D) = neigh_matrix @ features_neighs
    """
    del self_feats  # unused, exactly like the PyTorch module

    N, M = neigh_matrix.shape
    M2, D = features_neighs.shape
    assert M == M2, "inner dimensions must match"

    out_dtype = features_neighs.dtype
    a_bytes = jnp.dtype(neigh_matrix.dtype).itemsize
    b_bytes = jnp.dtype(features_neighs.dtype).itemsize
    o_bytes = jnp.dtype(out_dtype).itemsize

    cost = pl.CostEstimate(
        flops=2 * N * M * D,
        transcendentals=0,
        bytes_accessed=a_bytes * N * M + b_bytes * M * D + o_bytes * N * D,
    )
    cparams = dict(vmem_limit_bytes=vmem_limit_bytes)

    # -------- Fast path: features_neighs resident, full-K, 1-D grid over rows.
    tm_rows = _pick_row_tile(N, preferred=tm_pref)
    fast_vmem = (M * D * b_bytes                  # resident B panel (DMA'd once)
                 + 2 * tm_rows * M * a_bytes      # double-buffered A row block
                 + 2 * tm_rows * D * o_bytes)     # double-buffered output block
    if fast_vmem <= _VMEM_TILE_BUDGET:
        return pl.pallas_call(
            _single_k_kernel,
            out_shape=jax.ShapeDtypeStruct((N, D), out_dtype),
            grid_spec=pltpu.PrefetchScalarGridSpec(
                num_scalar_prefetch=0,
                grid=(pl.cdiv(N, tm_rows),),
                in_specs=[
                    pl.BlockSpec((tm_rows, M), lambda i: (i, 0)),  # neigh_matrix rows
                    pl.BlockSpec((M, D), lambda i: (0, 0)),        # features resident
                ],
                out_specs=pl.BlockSpec((tm_rows, D), lambda i: (i, 0)),
            ),
            compiler_params=pltpu.CompilerParams(
                dimension_semantics=("parallel",), **cparams),
            cost_estimate=cost,
        )(neigh_matrix, features_neighs)

    # -------- General tiled path (large M and/or D).
    tm = _pick_tile(N, tm_pref, 8)
    tn = _pick_tile(D, tn_pref, 128)

    # Pick the largest K tile that keeps double-buffered operands + output
    # (+ worst-case f32 scratch) under the VMEM budget; prefer the full M.
    per_k_bytes = 2 * (tm * a_bytes + tn * b_bytes)
    fixed_bytes = 2 * tm * tn * o_bytes + tm * tn * 4
    tk_cap = max((_VMEM_TILE_BUDGET - fixed_bytes) // per_k_bytes, 128)
    tk = _pick_tile(M, min(M, int(tk_cap)), 128)

    if tk == M:
        # Reduction fits one tile: no K grid axis, no accumulator machinery.
        return pl.pallas_call(
            _single_k_kernel,
            out_shape=jax.ShapeDtypeStruct((N, D), out_dtype),
            grid_spec=pltpu.PrefetchScalarGridSpec(
                num_scalar_prefetch=0,
                grid=(pl.cdiv(N, tm), pl.cdiv(D, tn)),
                in_specs=[
                    pl.BlockSpec((tm, M), lambda i, j: (i, 0)),
                    pl.BlockSpec((M, tn), lambda i, j: (0, j)),
                ],
                out_specs=pl.BlockSpec((tm, tn), lambda i, j: (i, j)),
            ),
            compiler_params=pltpu.CompilerParams(
                dimension_semantics=("parallel", "parallel"), **cparams),
            cost_estimate=cost,
        )(neigh_matrix, features_neighs)

    # Full 3-D tiled matmul with K reduction.
    grid = (pl.cdiv(N, tm), pl.cdiv(D, tn), pl.cdiv(M, tk))
    in_specs = [
        pl.BlockSpec((tm, tk), lambda i, j, k: (i, k)),  # neigh_matrix
        pl.BlockSpec((tk, tn), lambda i, j, k: (k, j)),  # features_neighs
    ]
    out_spec = pl.BlockSpec((tm, tn), lambda i, j, k: (i, j))

    if out_dtype == jnp.float32:
        kernel, scratch = _acc_in_out_kernel, []
    else:
        kernel, scratch = _acc_scratch_kernel, [pltpu.VMEM((tm, tn), jnp.float32)]

    return pl.pallas_call(
        kernel,
        out_shape=jax.ShapeDtypeStruct((N, D), out_dtype),
        grid_spec=pltpu.PrefetchScalarGridSpec(
            num_scalar_prefetch=0,
            grid=grid,
            in_specs=in_specs,
            out_specs=out_spec,
            scratch_shapes=scratch,
        ),
        compiler_params=pltpu.CompilerParams(
            dimension_semantics=("parallel", "parallel", "arbitrary"), **cparams),
        cost_estimate=cost,
    )(neigh_matrix, features_neighs)


if __name__ == "__main__":
    key = jax.random.PRNGKey(0)
    k1, k2, k3 = jax.random.split(key, 3)

    # Small shapes consistent with GraphSAGE usage:
    #   N = nodes in batch, M = unique neighbor nodes, D = neighbor feature dim.
    N, M, D = 128, 256, 128
    F_SELF = 128

    self_feats = jax.random.normal(k1, (N, F_SELF), dtype=jnp.float32)
    features_neighs = jax.random.normal(k2, (M, D), dtype=jnp.float32)
    # Row-normalized adjacency (mean aggregation matrix), as GraphSAGE builds it.
    adj = (jax.random.uniform(k3, (N, M)) < 0.1).astype(jnp.float32)
    row_sum = jnp.maximum(adj.sum(axis=1, keepdims=True), 1.0)
    neigh_matrix = adj / row_sum

    out = mean_aggregator_forward(self_feats, features_neighs, neigh_matrix)
    out = jax.block_until_ready(out)

    # Correctness check against plain JAX reference (torch.mm equivalent).
    ref = neigh_matrix @ features_neighs
    assert out.shape == (N, D)
    assert jnp.allclose(out, ref, atol=1e-5, rtol=1e-5)

    # Also exercise the general tiled path once (non-resident-B shapes, bf16 out).
    big_feats = jax.random.normal(k2, (512, 384), dtype=jnp.bfloat16)
    big_adj = jax.random.normal(k3, (160, 512), dtype=jnp.bfloat16)
    out2 = jax.block_until_ready(
        mean_aggregator_forward(self_feats, big_feats, big_adj))
    ref2 = jnp.dot(big_adj, big_feats, preferred_element_type=jnp.float32)
    assert jnp.allclose(out2.astype(jnp.float32), ref2, atol=2e-2, rtol=2e-2)

    print("KERNEL_OK")
</pallas_src>

<mosaic_0001>
module attributes {stable_mosaic.version = 11 : i64} {
  func.func @_single_k_kernel(%arg0: i32, %arg1: memref<64x256xf32, #tpu.memory_space<vmem>>, %arg2: memref<256x128xf32, #tpu.memory_space<vmem>>, %arg3: memref<64x128xf32, #tpu.memory_space<vmem>>) attributes {dimension_semantics = [#tpu.dimension_semantics<parallel>], iteration_bounds = array<i64: 2>, scalar_prefetch = 0 : i64, scratch_operands = 0 : i64, tpu.core_type = #tpu.core_type<tc>, window_params = [{transform_indices = @transform_0, window_bounds = array<i64: 64, 256>}, {pipeline_mode = #tpu.pipeline_mode<synchronous>, transform_indices = @transform_1, window_bounds = array<i64: 256, 128>}, {transform_indices = @transform_2, window_bounds = array<i64: 64, 128>}]} {
    %c0 = arith.constant 0 : index
    %c0_0 = arith.constant 0 : index
    %0 = vector.load %arg1[%c0, %c0_0] : memref<64x256xf32, #tpu.memory_space<vmem>>, vector<64x256xf32>
    %c0_1 = arith.constant 0 : index
    %c0_2 = arith.constant 0 : index
    %1 = vector.load %arg2[%c0_1, %c0_2] : memref<256x128xf32, #tpu.memory_space<vmem>>, vector<256x128xf32>
    %cst = arith.constant dense<0.000000e+00> : vector<64x128xf32>
    %2 = tpu.matmul %0, %1, %cst {dimension_numbers = #tpu.dot_dimension_numbers<[1], [0], [0], [1], [0, 0, 1, 1], [], []>} : vector<64x256xf32>, vector<256x128xf32>, vector<64x128xf32> -> vector<64x128xf32>
    %c0_3 = arith.constant 0 : index
    %c0_4 = arith.constant 0 : index
    %3 = vector.load %arg3[%c0_3, %c0_4] : memref<64x128xf32, #tpu.memory_space<vmem>>, vector<64x128xf32>
    tpu.vector_store %arg3[%c0_3, %c0_4], %2 {strides = array<i32>} : memref<64x128xf32, #tpu.memory_space<vmem>>, vector<64x128xf32>,
    return
  }
  func.func @transform_0(%arg0: i32) -> (i32, i32) {
    %c0_i32 = arith.constant 0 : i32
    %c0_i32_0 = arith.constant 0 : i32
    return %arg0, %c0_i32 : i32, i32
  }
  func.func @transform_1(%arg0: i32) -> (i32, i32) {
    %c0_i32 = arith.constant 0 : i32
    %c0_i32_0 = arith.constant 0 : i32
    %c0_i32_1 = arith.constant 0 : i32
    return %c0_i32, %c0_i32_0 : i32, i32
  }
  func.func @transform_2(%arg0: i32) -> (i32, i32) {
    %c0_i32 = arith.constant 0 : i32
    %c0_i32_0 = arith.constant 0 : i32
    return %arg0, %c0_i32 : i32, i32
  }
}

</mosaic_0001>

<bundles_post_ra>
// kernel: tpu_custom_call.1
= control target key start
LH: loop header
LB: loop body
LE: loop exit
PB: predicated region body
PF: predicated region fallthrough
CT: control target
= control target key end

     0   :  { %7 = vsyncpa [#allocation3], 0  ;;  %s999_s0 = inlined_call_operand.hbm [shape: f32[128,256], index: 0, kind: input, shape index: {}]   ;;  %s1000_s1 = inlined_call_operand.hbm [shape: f32[256,128], index: 1, kind: input, shape index: {}]   ;;  %s1001_s2 = inlined_call_operand.hbm [shape: f32[128,128], index: 2, kind: output, shape index: {}]  }
   0x1   :  { %9 = vsyncpa [#allocation3 + $0x1], 0 }
   0x2   :  { %10 = vsyncpa [#allocation6], 0 }
   0x3   :  { %11 = vsyncpa [#allocation4], 0 }
   0x4   :  { %13 = vsyncpa [#allocation4 + $0x1], 0  ;;  %s779_s9 = smov 0   ;;  %s781_s10 = smov 0  }
   0x5   :  { %s783_s11 = smov 0   ;;  %s785_s12 = smov 0  }
   0x6 LB: > { %s800_s13 = sadd.s32 4294967295, %s753_s12   ;;  %s438_s14 = sadd.s32 4294967294, %s753_s12   ;;  %s753_s12 = sphi %s785_s12, %s1021_s12   ;;  %s749_s11 = sphi %s783_s11, %s1020_s11   ;;  %s745_s10 = sphi %s781_s10, %s1019_s10   ;;  %s741_s9 = sphi %s779_s9, %s1018_s9  }
   0x7   : > { %p39_p0 = scmp.ne.s32.totalorder %s745_s10, %s741_s9  ;;  %p1002_p1 = scmp.eq.s32.totalorder %s800_s13, 0 }
   0x8   : > { %p90_p3 = scmp.eq.s32.totalorder %s438_s14, 1  ;;  %p439_p5 = scmp.ge.s32.totalorder %s753_s12, 1 }
   0x9   : > { %p809_p4 = por %p1002_p1, %p39_p0  ;;  %p97_p7 = scmp.lt.s32.totalorder %s753_s12, 3 }
   0xa   : > { %p814_p6 = por %p90_p3, %p39_p0  ;;  %s755_s18 = smov [#allocation5]  }
   0xb   : > { %s1005_s15 = scalar_select %p809_p4, 1, 0 }
   0xc   : > { %s1006_s16 = scalar_select %p814_p6, 1, 0 }
   0xd   : > { %p819_p8 = pnand %p439_p5, %p97_p7  ;;  %s109_s19 = sshll.u32 %s755_s18, 4  ;;  %s823_s19 = int_to_ptr.vmem [resolvable:$true] %s109_s19 }
   0xe   : > { %s835_s21 = sadd.s32 1, %s753_s12   ;;  %s26_s22 = sadd.s32 1, %s749_s11 }
   0xf   : > { %s1007_s17 = scalar_select %p819_p8, 1, 0 }
  0x10   : > { %p570_p9 = pneg %p819_p8  ;;  %s23_s23 = ssub.s32 %s753_s12, %s835_s21 }
  0x11   : > { %s625_s26 = scalar_lea.hbm %s1000_s1, 4096 }
  0x12   : > { %p830_p11 = pnand %p570_p9, %p1002_p1  ;;  %p626_p12 = scmp.ne.s32.totalorder %s1000_s1, %s625_s26 }
  0x13   : > { %p632_p5 = scmp.lt.u32.totalorder %s625_s26, %s1000_s1 }
  0x14   : > { %p627_p13 = pneg %p830_p11 }
  0x16   : > { %p628_p0 = pnand %p627_p13, %p626_p12 }
  0x18   : > { %p629_p3 = pneg %p628_p0 }
  0x1a   : > { %p634_p7 = pnand %p632_p5, %p629_p3 }
  0x1c   : > { %637 = shalt.err (!%p634_p7)
}
  0x1d   : > { %s638_s3 = scalar_lea.vmem %s823_s19, 4096  ;;  %p646_p2 = scmp.lt.s32.totalorder %s823_s19, %s823_s19 }
  0x1e   : > { %p639_p9 = scmp.ne.s32.totalorder %s823_s19, %s638_s3  ;;  %p647_p6 = scmp.lt.s32.totalorder %s638_s3, %s638_s3 }
  0x20   : > { %p641_p10 = pnand %p639_p9, %p627_p13  ;;  %p648_p4 = por %p647_p6, %p646_p2 }
  0x22   : > { %p642_p1 = pneg %p641_p10 }
  0x24   : > { %p649_p8 = pnand %p648_p4, %p642_p1 }
  0x26   : > { %652 = shalt.err (!%p649_p8)
}
  0x27   : > { %s756_s4 = smov 128   ;;  %s757_s5 = smov 8  }
  0x28   : > { %573 = dma.hbm_to_vmem [thread:$0]  (!%p830_p11), %s1000_s1, 4096, %s823_s19, [#allocation6], %s756_s4, %s756_s4, %s757_s5  }
  0x29   : > { %p24_p2 = scmp.eq.s32.totalorder %s23_s23, 0  ;;  %p33_p1 = scmp.ne.s32.totalorder %s749_s11, %s745_s10 }
  0x2a   : > { %p34_p4 = scmp.eq.s32.totalorder %s753_s12, 0  ;;  %p583_p6 = scmp.lt.s32.totalorder %s753_s12, 2 }
  0x2b   : > { %s866_s8 = scalar_select %p24_p2, %s749_s11, %s26_s22  }
  0x2c   : > { %p35_p8 = por %p34_p4, %p33_p1  ;;  %p1009_p10 = scmp.eq.s32.totalorder %s800_s13, 1 }
  0x2d   : > { %s123_s18 = sand.u32 1, %s749_s11   ;;  %s456_s24 = sshll.u32 %s753_s12, 11 }
  0x2e   : > { %p870_p12 = por %p1009_p10, %p33_p1  ;;  %s442_s25 = sshll.u32 %s123_s18, 7 }
  0x2f   : > { %s879_s27 = scalar_lea.hbm %s999_s0, %s456_s24  ;;  %s127_s19 = scalar_lea.vmem [#allocation2], %s442_s25 }
  0x30   : > { %s135_s22 = sshll.u32 %s127_s19, 4  ;;  %p881_p11 = pnand %p583_p6, %p35_p8  ;;  %s885_s22 = int_to_ptr.vmem [resolvable:$true] %s135_s22 }
  0x31   : > { %s887_s28 = scalar_lea.sflag [#allocation3], %s123_s18  ;;  %s653_s29 = scalar_lea.hbm %s879_s27, 2048 }
  0x32   : > { %p654_p13 = scmp.ne.s32.totalorder %s879_s27, %s653_s29  ;;  %p655_p0 = pneg %p881_p11 }
  0x33   : > { %s658_s4 = scalar_lea.hbm %s999_s0, 4096  ;;  %p659_p7 = scmp.lt.u32.totalorder %s879_s27, %s999_s0 }
  0x34   : > { %p656_p3 = pnand %p655_p0, %p654_p13  ;;  %p660_p9 = scmp.lt.u32.totalorder %s658_s4, %s653_s29 }
  0x35   : > { %p662_p1 = scmp.lt.u32.totalorder %s653_s29, %s879_s27 }
  0x36   : > { %p657_p5 = pneg %p656_p3  ;;  %p661_p2 = por %p660_p9, %p659_p7 }
  0x38   : > { %p663_p4 = por %p662_p1, %p661_p2 }
  0x3a   : > { %p664_p6 = pnand %p663_p4, %p657_p5 }
  0x3c   : > { %667 = shalt.err (!%p664_p6)
}
  0x3d   : > { %s668_s7 = scalar_lea.vmem %s885_s22, 2048  ;;  %s758_s18 = smov [#allocation2]  }
  0x3e   : > { %p669_p8 = scmp.ne.s32.totalorder %s885_s22, %s668_s7  ;;  %s673_s24 = sshll.u32 %s758_s18, 4  ;;  %s674_s24 = int_to_ptr.vmem [resolvable:$false] %s673_s24 }
  0x3f   : > { %s675_s25 = scalar_lea.vmem %s674_s24, 4096  ;;  %p676_p3 = scmp.lt.s32.totalorder %s885_s22, %s674_s24 }
  0x40   : > { %p671_p10 = pnand %p669_p8, %p655_p0  ;;  %p677_p7 = scmp.lt.s32.totalorder %s675_s25, %s668_s7 }
  0x42   : > { %p672_p13 = pneg %p671_p10  ;;  %p678_p9 = por %p677_p7, %p676_p3 }
  0x44   : > { %p679_p2 = pnand %p678_p9, %p672_p13 }
  0x46   : > { %682 = shalt.err (!%p679_p2)
}
  0x47   : > { %s759_s20 = smov 256   ;;  %s760_s26 = smov 16  }
  0x48   : > { %577 = dma.hbm_to_vmem [thread:$0]  (!%p881_p11), %s879_s27, 2048, %s885_s22, %s887_s28, %s759_s20, %s759_s20, %s760_s26  }
  0x49   : > { %p1012_p0 = scmp.ne.s32.totalorder %s1007_s17, 0 }
  0x4a   : > { %s918_s19 = sand.u32 (!%p1012_p0), 1, %s745_s10   ;;  %p1013_p5 = scmp.ne.s32.totalorder (!%p1012_p0), %s1005_s15, 0 }
  0x4b   : > { %147 = sbr.rel (%p1012_p0) target bundleno = 363 (0x16b), region = 28  ;;  %s447_s29 = sshll.u32 (!%p1012_p0), %s918_s19, 7 }
  0x4c   : > { %s150_s30 = scalar_lea.sflag (!%p1012_p0), [#allocation3], %s918_s19  ;;  %s922_s3 = scalar_lea.vmem (!%p1012_p0), [#allocation2], %s447_s29 }
  0x52   : > { %728 = dma.done.wait (%p1013_p5), %s150_s30, 2048  }
  0x53   : > { %730 = vsyncadd (%p1013_p5), %s150_s30, 4294965248  ;;  %p1014_p11 = scmp.eq.s32.totalorder %s800_s13, 0 }
  0x55   : > { %732 = dma.done.wait (%p1014_p11), [#allocation6], 4096   ;;  %p1015_p1 = pmov %p1014_p11 }
  0x56   : > { %v212_v0 = vld [vmem:[#allocation5 + $0x80] sm:$0xff]  ;;  %v213_v1 = vld [vmem:[#allocation5 + $0x88] sm:$0xff]  ;;  %v214_v5 = vld [vmem:[#allocation5 + $0x90] sm:$0xff]  ;;  %s449_s15 = sshll.u32 %s918_s19, 6  ;;  %s457_s22 = sshll.u32 %s800_s13, 10 }
  0x57   : > { %734 = vsyncadd (%p1015_p1), [#allocation6], 4294963200  ;;  %v196_v2 = vld [vmem:[#allocation5] sm:$0xff]  ;;  %v514_v3 = vpack.c.bf16 %v213_v1, %v212_v0  ;;  %v197_v4 = vld [vmem:[#allocation5 + $0x8] sm:$0xff]  ;;  %s177_s17 = scalar_lea.vmem [#allocation7], %s449_s15  ;;  %s955_s4 = scalar_lea.hbm %s1001_s2, %s457_s22 }
  0x58   : > { %v215_v6 = vld [vmem:[#allocation5 + $0x98] sm:$0xff]  ;;  %v516_v7 = vpack.c.bf16 %v197_v4, %v196_v2  ;;  %v198_v9 = vld [vmem:[#allocation5 + $0x10] sm:$0xff]  ;;  %v216_v11 = vld [vmem:[#allocation5 + $0xa0] sm:$0xff]  ;;  %s355_s27 = sshll.u32 %s177_s17, 4  ;;  %s342_s13 = scalar_lea.sflag [#allocation4], %s918_s19  ;;  %s950_s27 = int_to_ptr.vmem [resolvable:$true] %s355_s27 }
  0x59   : > { %v518_v8 = vpack.c.bf16 %v215_v6, %v214_v5  ;;  %v199_v10 = vld [vmem:[#allocation5 + $0x18] sm:$0xff]  ;;  %515 = vmatprep.subr.bf16.mxu0 %v514_v3  ;;  %546 = vmatprep.subr.bf16.mxu1 %v514_v3  ;;  %v217_v12 = vld [vmem:[#allocation5 + $0xa8] sm:$0xff]  ;;  %v200_v15 = vld [vmem:[#allocation5 + $0x20] sm:$0xff]  ;;  %s683_s5 = scalar_lea.vmem %s950_s27, 1024  ;;  %s761_s6 = smov [#allocation7]  }
  0x5a   : > { %517 = vmatpush3.bf16.msra.mxu0 %v516_v7  ;;  %554 = vmatpush3.bf16.msra.mxu1 %v516_v7  ;;  %v520_v13 = vpack.c.bf16 %v199_v10, %v198_v9  ;;  %v522_v14 = vpack.c.bf16 %v217_v12, %v216_v11  ;;  %v201_v16 = vld [vmem:[#allocation5 + $0x28] sm:$0xff]  ;;  %v218_v17 = vld [vmem:[#allocation5 + $0xb0] sm:$0xff]  ;;  %v219_v18 = vld [vmem:[#allocation5 + $0xb8] sm:$0xff]  ;;  %p684_p4 = scmp.ne.s32.totalorder %s950_s27, %s683_s5  ;;  %s687_s7 = sshll.u32 %s761_s6, 4  ;;  %s688_s7 = int_to_ptr.vmem [resolvable:$false] %s687_s7 }
  0x5b   : > { %519 = vmatprep.subr.bf16.mxu0 %v518_v8  ;;  %547 = vmatprep.subr.bf16.mxu1 %v518_v8  ;;  %v524_v19 = vpack.c.bf16 %v201_v16, %v200_v15  ;;  %v526_v20 = vpack.c.bf16 %v219_v18, %v218_v17  ;;  %v202_v21 = vld [vmem:[#allocation5 + $0x30] sm:$0xff]  ;;  %v203_v22 = vld [vmem:[#allocation5 + $0x38] sm:$0xff]  ;;  %v220_v23 = vld [vmem:[#allocation5 + $0xc0] sm:$0xff]  ;;  %s689_s18 = scalar_lea.vmem %s688_s7, 2048  ;;  %p690_p10 = scmp.lt.s32.totalorder %s950_s27, %s688_s7 }
  0x5c   : > { %v221_v24 = vld [vmem:[#allocation5 + $0xc8] sm:$0xff]  ;;  %v528_v27 = vpack.c.bf16 %v203_v22, %v202_v21  ;;  %v204_v29 = vld [vmem:[#allocation5 + $0x40] sm:$0xff]  ;;  %v222_v31 = vld [vmem:[#allocation5 + $0xd0] sm:$0xff]  ;;  %p685_p6 = pnand %p684_p4, %p870_p12  ;;  %p691_p13 = scmp.lt.s32.totalorder %s689_s18, %s683_s5 }
  0x5d   : > { %v181_v25 = vld [vmem:[%s922_s3 + $0x8] sm:$0xff]  ;;  %v530_v28 = vpack.c.bf16 %v221_v24, %v220_v23  ;;  %v223_v32 = vld [vmem:[#allocation5 + $0xd8] sm:$0xff]  ;;  %v206_v35 = vld [vmem:[#allocation5 + $0x50] sm:$0xff] }
  0x5e   : > { %521 = vmatpush3.bf16.msra.mxu0 %v520_v13  ;;  %555 = vmatpush3.bf16.msra.mxu1 %v520_v13  ;;  %v189_v26 = vld [vmem:[%s922_s3 + $0x48] sm:$0xff]  ;;  %v534_v34 = vpack.c.bf16 %v223_v32, %v222_v31  ;;  %v207_v36 = vld [vmem:[#allocation5 + $0x58] sm:$0xff]  ;;  %v224_v37 = vld [vmem:[#allocation5 + $0xe0] sm:$0xff]  ;;  %p686_p8 = pneg %p685_p6  ;;  %p692_p3 = por %p691_p13, %p690_p10 }
  0x5f   : > { %523 = vmatprep.subr.bf16.mxu0 %v522_v14  ;;  %548 = vmatprep.subr.bf16.mxu1 %v522_v14  ;;  %v205_v30 = vld [vmem:[#allocation5 + $0x48] sm:$0xff]  ;;  %v536_v39 = vpack.c.bf16 %v207_v36, %v206_v35  ;;  %v208_v41 = vld [vmem:[#allocation5 + $0x60] sm:$0xff]  ;;  %v226_v43 = vld [vmem:[#allocation5 + $0xf0] sm:$0xff] }
  0x60   : > { %292 = vmatprep.mubr.f32.mxu0 %v181_v25  ;;  %312 = vmatprep.mubr.f32.mxu1 %v189_v26  ;;  %v532_v33 = vpack.c.bf16 %v205_v30, %v204_v29  ;;  %v225_v38 = vld [vmem:[#allocation5 + $0xe8] sm:$0xff]  ;;  %v227_v44 = vld [vmem:[#allocation5 + $0xf8] sm:$0xff]  ;;  %v210_v47 = vld [vmem:[#allocation5 + $0x70] sm:$0xff]  ;;  %p693_p7 = pnand %p692_p3, %p686_p8 }
  0x61   : > { %v538_v40 = vpack.c.bf16 %v225_v38, %v224_v37  ;;  %v209_v42 = vld [vmem:[#allocation5 + $0x68] sm:$0xff]  ;;  %v542_v46 = vpack.c.bf16 %v227_v44, %v226_v43  ;;  %v211_v48 = vld [vmem:[#allocation5 + $0x78] sm:$0xff]  ;;  %v180_v50 = vld [vmem:[%s922_s3] sm:$0xff] }
  0x62   : > { %525 = vmatpush3.bf16.msra.mxu0 %v524_v19  ;;  %556 = vmatpush3.bf16.msra.mxu1 %v524_v19  ;;  %v540_v45 = vpack.c.bf16 %v209_v42, %v208_v41  ;;  %v544_v49 = vpack.c.bf16 %v211_v48, %v210_v47  ;;  %v188_v51 = vld [vmem:[%s922_s3 + $0x40] sm:$0xff]  ;;  %v183_v52 = vld [vmem:[%s922_s3 + $0x18] sm:$0xff]  ;;  %v182_v54 = vld [vmem:[%s922_s3 + $0x10] sm:$0xff] }
  0x63   : > { %527 = vmatprep.subr.bf16.mxu0 %v526_v20  ;;  %549 = vmatprep.subr.bf16.mxu1 %v526_v20  ;;  %v191_v53 = vld [vmem:[%s922_s3 + $0x58] sm:$0xff]  ;;  %v190_v55 = vld [vmem:[%s922_s3 + $0x50] sm:$0xff]  ;;  %v185_v56 = vld [vmem:[%s922_s3 + $0x28] sm:$0xff] }
  0x64   : > { %v193_v57 = vld [vmem:[%s922_s3 + $0x68] sm:$0xff]  ;;  %v184_v58 = vld [vmem:[%s922_s3 + $0x20] sm:$0xff]  ;;  %v187_v60 = vld [vmem:[%s922_s3 + $0x38] sm:$0xff] }
  0x65   : > { %v192_v59 = vld [vmem:[%s922_s3 + $0x60] sm:$0xff]  ;;  %v195_v61 = vld [vmem:[%s922_s3 + $0x78] sm:$0xff]  ;;  %v186_v62 = vld [vmem:[%s922_s3 + $0x30] sm:$0xff] }
  0x66   : > { %529 = vmatpush3.bf16.msra.mxu0 %v528_v27  ;;  %557 = vmatpush3.bf16.msra.mxu1 %v528_v27  ;;  %v194_v63 = vld [vmem:[%s922_s3 + $0x70] sm:$0xff] }
  0x67   : > { %531 = vmatprep.subr.bf16.mxu0 %v530_v28  ;;  %550 = vmatprep.subr.bf16.mxu1 %v530_v28 }
  0x6a   : > { %533 = vmatpush3.bf16.msra.mxu0 %v532_v33  ;;  %558 = vmatpush3.bf16.msra.mxu1 %v532_v33 }
  0x6b   : > { %535 = vmatprep.subr.bf16.mxu0 %v534_v34  ;;  %551 = vmatprep.subr.bf16.mxu1 %v534_v34 }
  0x6e   : > { %537 = vmatpush3.bf16.msra.mxu0 %v536_v39  ;;  %559 = vmatpush3.bf16.msra.mxu1 %v536_v39 }
  0x6f   : > { %539 = vmatprep.subr.bf16.mxu0 %v538_v40  ;;  %552 = vmatprep.subr.bf16.mxu1 %v538_v40 }
  0x72   : > { %541 = vmatpush3.bf16.msra.mxu0 %v540_v45  ;;  %560 = vmatpush3.bf16.msra.mxu1 %v540_v45 }
  0x73   : > { %543 = vmatprep.subr.bf16.mxu0 %v542_v46  ;;  %553 = vmatprep.subr.bf16.mxu1 %v542_v46 }
  0x76   : > { %545 = vmatpush3.bf16.msra.mxu0 %v544_v49  ;;  %561 = vmatpush3.bf16.msra.mxu1 %v544_v49 }
  0x79   : > { %293 = vmatmul.mubr.f32.vlgmr.msra.gmra.mrb[0].mxu0 %v180_v50  ;;  %313 = vmatmul.mubr.f32.vlgmr.msra.gmra.mrb[0].mxu1 %v188_v51 }
  0x7a   : > { %297 = vmatprep.mubr.f32.mxu0 %v183_v52  ;;  %317 = vmatprep.mubr.f32.mxu1 %v191_v53 }
  0x7d   : > { %298 = vmatmul.mubr.f32.gmra.mrb[2].mxu0 %v182_v54  ;;  %318 = vmatmul.mubr.f32.gmra.mrb[2].mxu1 %v190_v55 }
  0x7e   : > { %302 = vmatprep.mubr.f32.mxu0 %v185_v56  ;;  %322 = vmatprep.mubr.f32.mxu1 %v193_v57 }
  0x81   : > { %303 = vmatmul.mubr.f32.gmra.mrb[4].mxu0 %v184_v58  ;;  %323 = vmatmul.mubr.f32.gmra.mrb[4].mxu1 %v192_v59 }
  0x82   : > { %307 = vmatprep.mubr.f32.mxu0 %v187_v60  ;;  %327 = vmatprep.mubr.f32.mxu1 %v195_v61 }
  0x85   : > { %308 = vmatmul.mubr.f32.gmra.mrb[6].mxu0 %v186_v62  ;;  %328 = vmatmul.mubr.f32.gmra.mrb[6].mxu1 %v194_v63 }
 0x14c   : > { %v490_v0 = vpop.f32.mrb[0].mxu0  ;;  %v502_v1 = vpop.f32.mrb[0].mxu1 }
 0x14d   : > { %v491_v2 = vpop.f32.mrb[1].mxu0  ;;  %v503_v3 = vpop.f32.mrb[1].mxu1 }
 0x14e   : > { %v492_v4 = vadd.f32 %v491_v2, %v490_v0  ;;  %v504_v5 = vadd.f32 %v503_v3, %v502_v1 }
 0x150   : > { %333 = vst [vmem:[%s177_s17] sm:$0xff] %v492_v4  ;;  %337 = vst [vmem:[%s177_s17 + $0x20] sm:$0xff] %v504_v5  ;;  %v493_v6 = vpop.f32.mrb[2].mxu0  ;;  %v505_v7 = vpop.f32.mrb[2].mxu1 }
 0x151   : > { %v494_v8 = vpop.f32.mrb[3].mxu0  ;;  %v506_v9 = vpop.f32.mrb[3].mxu1 }
 0x152   : > { %v495_v10 = vadd.f32 %v494_v8, %v493_v6  ;;  %v507_v11 = vadd.f32 %v506_v9, %v505_v7 }
 0x154   : > { %334 = vst [vmem:[%s177_s17 + $0x8] sm:$0xff] %v495_v10  ;;  %338 = vst [vmem:[%s177_s17 + $0x28] sm:$0xff] %v507_v11  ;;  %v496_v12 = vpop.f32.mrb[4].mxu0  ;;  %v508_v13 = vpop.f32.mrb[4].mxu1 }
 0x155   : > { %v497_v14 = vpop.f32.mrb[5].mxu0  ;;  %v509_v15 = vpop.f32.mrb[5].mxu1 }
 0x156   : > { %v498_v16 = vadd.f32 %v497_v14, %v496_v12  ;;  %v510_v17 = vadd.f32 %v509_v15, %v508_v13 }
 0x158   : > { %335 = vst [vmem:[%s177_s17 + $0x10] sm:$0xff] %v498_v16  ;;  %339 = vst [vmem:[%s177_s17 + $0x30] sm:$0xff] %v510_v17  ;;  %v499_v18 = vpop.f32.mrb[6].mxu0  ;;  %v511_v19 = vpop.f32.mrb[6].mxu1 }
 0x159   : > { %v500_v20 = vpop.f32.mrb[7].mxu0  ;;  %v512_v21 = vpop.f32.mrb[7].mxu1 }
 0x15a   : > { %v501_v22 = vadd.f32 %v500_v20, %v499_v18  ;;  %v513_v23 = vadd.f32 %v512_v21, %v511_v19 }
 0x15c   : > { %336 = vst [vmem:[%s177_s17 + $0x18] sm:$0xff] %v501_v22  ;;  %340 = vst [vmem:[%s177_s17 + $0x38] sm:$0xff] %v513_v23 }
 0x15d   : > { %696 = shalt.err (!%p693_p7)
}
 0x15e   : > { %s697_s24 = scalar_lea.hbm %s955_s4, 1024  ;;  %s701_s26 = scalar_lea.hbm %s1001_s2, 2048 }
 0x15f   : > { %p698_p9 = scmp.ne.s32.totalorder %s955_s4, %s697_s24  ;;  %p702_p5 = scmp.lt.u32.totalorder %s955_s4, %s1001_s2 }
 0x160   : > { %p703_p11 = scmp.lt.u32.totalorder %s701_s26, %s697_s24  ;;  %p705_p4 = scmp.lt.u32.totalorder %s697_s24, %s955_s4 }
 0x161   : > { %p699_p2 = pnand %p698_p9, %p870_p12 }
 0x162   : > { %p704_p1 = por %p703_p11, %p702_p5 }
 0x163   : > { %p700_p0 = pneg %p699_p2 }
 0x164   : > { %p706_p6 = por %p705_p4, %p704_p1 }
 0x166   : > { %p707_p8 = pnand %p706_p6, %p700_p0 }
 0x168   : > { %710 = shalt.err (!%p707_p8)
}
 0x169   : > { %s762_s3 = smov 128   ;;  %s763_s15 = smov 8  }
 0x16a   : > { %568 = dma.vmem_to_hbm [thread:$0]  (%p870_p12), %s950_s27, 1024, %s955_s4, %s342_s13, %s762_s3, %s762_s3, %s763_s15  }
 0x16b PF: > { %s370_s17 = sand.u32 1, %s741_s9   ;;  %p1016_p10 = scmp.ne.s32.totalorder %s1006_s16, 0 }
 0x16c   : > { %p1017_p13 = scmp.ge.s32.totalorder %s753_s12, 2  ;;  %s371_s22 = scalar_lea.sflag [#allocation4], %s370_s17 }
 0x16e   : > { %p579_p3 = pnand %p1017_p13, %p1016_p10 }
 0x170   : > { %736 = dma.done.wait (!%p579_p3), %s371_s22, 1024  }
 0x171   : > { %738 = vsyncadd (!%p579_p3), %s371_s22, 4294966272  ;;  %p16_p7 = scmp.ge.s32.totalorder %s835_s21, 4   ;;  %s1018_s9 = smov %s745_s10 }
 0x172   : > { %s1019_s10 = smov %s749_s11  ;;  %s1020_s11 = smov %s866_s8 }
 0x173   : > { %s1021_s12 = smov %s835_s21  ;;  %18 = sbr.rel (!%p16_p7) target bundleno = 6 (0x6), region = 77 }
 0x17a   :  { %376 = vsyncpa [#allocation3], 1 }
 0x17b   :  { %378 = vsyncpa [#allocation3 + $0x1], 1 }
 0x17c   :  { %379 = vsyncpa [#allocation6], 1 }
 0x17d   :  { %380 = vsyncpa [#allocation4], 1 }
 0x17e   :  { %382 = vsyncpa [#allocation4 + $0x1], 1 }

</bundles_post_ra>
